<compile_context>
chip_gen: v6e
topology: v6e:2x2x1
jax: 0.10.0
libtpu: 0.0.40
codegen_flags: <defaults>
</compile_context>

<pallas_src>
import math

import jax
import jax.numpy as jnp
from jax.experimental import pallas as pl
from jax.experimental.pallas import tpu as pltpu


# ---------------------------------------------------------------------------
# Kernels
# ---------------------------------------------------------------------------
def _make_mean_mid_kernel(r_total, tk, needs_mask):
    """Mean over the middle axis of a (tp, tk, tr) block, K-tiled over grid[2]."""
    inv_r = 1.0 / float(r_total)

    def kernel(x_ref, o_ref, acc_ref):
        k = pl.program_id(2)

        @pl.when(k == 0)
        def _init():
            acc_ref[...] = jnp.zeros_like(acc_ref)

        x = x_ref[...]
        if needs_mask:
            # Zero the rows of a partial last K block (R not a multiple of tk).
            row = jax.lax.broadcasted_iota(jnp.int32, (1, tk, x.shape[-1]), 1)
            keep = (row + k * tk) < r_total
            x = jnp.where(keep, x, jnp.zeros_like(x))
        # Widen to f32 inside the reduction (no full-block cast materialized).
        acc_ref[...] += jnp.sum(x, axis=1, dtype=jnp.float32)

        @pl.when(k == pl.num_programs(2) - 1)
        def _finalize():
            o_ref[...] = (acc_ref[...] * inv_r).astype(o_ref.dtype)

    return kernel


def _make_mean_last_kernel(r_total, tk, needs_mask):
    """Mean over the last (lane) axis of a (tp, tk) block, K-tiled over grid[1]."""
    inv_r = 1.0 / float(r_total)

    def kernel(x_ref, o_ref, acc_ref):
        k = pl.program_id(1)

        @pl.when(k == 0)
        def _init():
            acc_ref[...] = jnp.zeros_like(acc_ref)

        x = x_ref[...]
        if needs_mask:
            col = jax.lax.broadcasted_iota(jnp.int32, (1, tk), 1)
            keep = (col + k * tk) < r_total
            x = jnp.where(keep, x, jnp.zeros_like(x))
        acc_ref[...] += jnp.sum(x, axis=1, keepdims=True, dtype=jnp.float32)

        @pl.when(k == pl.num_programs(1) - 1)
        def _finalize():
            o_ref[...] = (acc_ref[...] * inv_r).astype(o_ref.dtype)

    return kernel


# ---------------------------------------------------------------------------
# Tiling / budget helpers
# ---------------------------------------------------------------------------
def _round_up(n, m):
    return (n + m - 1) // m * m


def _sublane_pack(dtype):
    # Packed-sublane multiple per dtype width (f32: 8, bf16: 16, int8/fp8: 32).
    return {4: 8, 2: 16, 1: 32}.get(jnp.dtype(dtype).itemsize, 8)


def _vmem_budgets():
    """(live double-buffered working-set budget, vmem_limit_bytes) per chip gen."""
    cap = None
    try:
        cap = getattr(pltpu.get_tpu_info(), "vmem_capacity_bytes", None)
    except Exception:
        cap = None
    if not cap:
        cap = 64 * 1024 * 1024  # conservative default (v7x per-TC VMEM)
    live = min(max(cap * 3 // 8, 12 * 1024 * 1024), 48 * 1024 * 1024)
    limit = min(max(cap // 2, 32 * 1024 * 1024), 96 * 1024 * 1024)
    return live, limit


def _plan_mid(pre, r, post, itemsize, sub, budget):
    """Pick (tp, tk, tr) for the middle-axis reduction: lane tile first."""
    tr = min(2048, _round_up(post, 128))

    def block_bytes(tp, tk, tr_):
        return (2 * tp * tk * tr_ * itemsize   # double-buffered input block
                + 2 * tp * tr_ * itemsize      # double-buffered output block
                + tp * tr_ * 4)                # f32 accumulator scratch

    while tr > 128 and block_bytes(sub, min(r, sub), tr) > budget:
        tr -= 128
    tr = max(tr, 128)

    # Reduction tile: all of R if it fits at the minimum row tile, else K-tile.
    if block_bytes(sub, r, tr) <= budget:
        tk = r
    else:
        per_k = 2 * sub * tr * itemsize
        fixed = 2 * sub * tr * itemsize + sub * tr * 4
        tk = max(sub, ((budget - fixed) // per_k) // sub * sub)
        tk = min(tk, r)

    # Row tile from whatever budget is left.
    per_row = 2 * tk * tr * itemsize + 2 * tr * itemsize + tr * 4
    tp = max(sub, (budget // per_row) // sub * sub)
    tp = min(tp, pre)  # == pre (full extent) or a multiple of `sub`
    return tp, tk, tr


def _plan_last(pre, r, itemsize, sub, budget):
    """Pick (tp, tk) for the last-axis (lane) reduction path."""
    tk = min(2048, _round_up(r, 128))

    def block_bytes(tp, tk_):
        return 2 * tp * tk_ * itemsize + 2 * tp * itemsize + tp * 4

    while tk > 128 and block_bytes(sub, tk) > budget:
        tk -= 128
    tk = max(tk, 128)

    per_row = 2 * tk * itemsize + 2 * itemsize + 4
    tp = max(sub, (budget // per_row) // sub * sub)
    tp = min(tp, pre)
    return tp, tk


# ---------------------------------------------------------------------------
# Public wrapper
# ---------------------------------------------------------------------------
def mean_forward(x, dim=0, *, max_block_bytes=None):
    """Pallas equivalent of Mean(dim).forward(x): mean over axis dim + 1."""
    x = jnp.asarray(x)
    if not jnp.issubdtype(x.dtype, jnp.floating):
        # torch.mean requires a floating dtype; promote for robustness.
        x = x.astype(jnp.float32)

    axis = (dim + 1) % x.ndim
    shape = x.shape
    r = shape[axis]
    pre = math.prod(shape[:axis]) if axis > 0 else 1
    post = math.prod(shape[axis + 1:]) if axis + 1 < len(shape) else 1
    out_shape_final = shape[:axis] + shape[axis + 1:]

    itemsize = jnp.dtype(x.dtype).itemsize
    sub = _sublane_pack(x.dtype)
    budget, vmem_limit = _vmem_budgets()
    if max_block_bytes is not None:
        budget = int(max_block_bytes)

    if post == 1:
        # Mean over the last axis: reduce along lanes; every loaded byte useful.
        x2 = x.reshape(pre, r)
        tp, tk = _plan_last(pre, r, itemsize, sub, budget)
        needs_mask = (r % tk) != 0
        grid = (pl.cdiv(pre, tp), pl.cdiv(r, tk))
        out2 = pl.pallas_call(
            _make_mean_last_kernel(r, tk, needs_mask),
            out_shape=jax.ShapeDtypeStruct((pre, 1), x.dtype),
            grid=grid,
            in_specs=[pl.BlockSpec((tp, tk), lambda i, k: (i, k))],
            out_specs=pl.BlockSpec((tp, 1), lambda i, k: (i, 0)),
            scratch_shapes=[pltpu.VMEM((tp, 1), jnp.float32)],
            compiler_params=pltpu.CompilerParams(
                dimension_semantics=("parallel", "arbitrary"),
                vmem_limit_bytes=vmem_limit,
            ),
        )(x2)
        return out2.reshape(out_shape_final)

    # General case: free reshape to (pre, R, post); reduce the middle axis.
    x3 = x.reshape(pre, r, post)
    tp, tk, tr = _plan_mid(pre, r, post, itemsize, sub, budget)
    needs_mask = (r % tk) != 0
    grid = (pl.cdiv(pre, tp), pl.cdiv(post, tr), pl.cdiv(r, tk))

    out2 = pl.pallas_call(
        _make_mean_mid_kernel(r, tk, needs_mask),
        out_shape=jax.ShapeDtypeStruct((pre, post), x.dtype),
        grid=grid,
        in_specs=[pl.BlockSpec((tp, tk, tr), lambda i, j, k: (i, k, j))],
        out_specs=pl.BlockSpec((tp, tr), lambda i, j, k: (i, j)),
        scratch_shapes=[pltpu.VMEM((tp, tr), jnp.float32)],
        compiler_params=pltpu.CompilerParams(
            dimension_semantics=("parallel", "parallel", "arbitrary"),
            vmem_limit_bytes=vmem_limit,
        ),
    )(x3)
    return out2.reshape(out_shape_final)


# ---------------------------------------------------------------------------
# Self-test
# ---------------------------------------------------------------------------
if __name__ == "__main__":
    key = jax.random.PRNGKey(0)
    k1, k2, k3 = jax.random.split(key, 3)

    # Primary case: [B, C, H, W]; module default dim=0 -> reduce axis 1.
    x = jax.random.normal(key, (2, 4, 16, 16), dtype=jnp.float32)
    out = mean_forward(x, dim=0)
    out = jax.block_until_ready(out)
    ref = jnp.mean(x, axis=1)
    assert out.shape == ref.shape, (out.shape, ref.shape)
    assert out.dtype == x.dtype
    assert bool(jnp.allclose(out, ref, atol=1e-5, rtol=1e-5)), "mismatch (main case)"

    # Ragged lane dim (post not a multiple of 128) -> partial edge lane block.
    xr = jax.random.normal(k1, (2, 4, 6, 10), dtype=jnp.float32)
    assert bool(jnp.allclose(mean_forward(xr, dim=0), jnp.mean(xr, axis=1),
                             atol=1e-5, rtol=1e-5)), "mismatch (ragged post)"

    # Mean over the last axis (post == 1) -> lane-axis reduction path.
    xl = jax.random.normal(k2, (2, 3, 5, 7), dtype=jnp.float32)
    assert bool(jnp.allclose(mean_forward(xl, dim=2), jnp.mean(xl, axis=3),
                             atol=1e-5, rtol=1e-5)), "mismatch (last axis)"

    # Tiny budget forces reduction-axis (K) tiling + in-kernel edge masking.
    xk = jax.random.normal(k3, (2, 37, 16, 16), dtype=jnp.float32)
    assert bool(jnp.allclose(mean_forward(xk, dim=0, max_block_bytes=64 * 1024),
                             jnp.mean(xk, axis=1),
                             atol=1e-5, rtol=1e-5)), "mismatch (K-tiled)"

    print("KERNEL_OK")
</pallas_src>

<mosaic_0001>
module attributes {stable_mosaic.version = 11 : i64} {
  func.func @kernel(%arg0: i32, %arg1: i32, %arg2: i32, %arg3: memref<2x4x256xf32, #tpu.memory_space<vmem>>, %arg4: memref<2x256xf32, #tpu.memory_space<vmem>>, %arg5: memref<2x256xf32, #tpu.memory_space<vmem>>) attributes {dimension_semantics = [#tpu.dimension_semantics<parallel>, #tpu.dimension_semantics<parallel>, #tpu.dimension_semantics<arbitrary>], iteration_bounds = array<i64: 1, 1, 1>, scalar_prefetch = 0 : i64, scratch_operands = 1 : i64, tpu.core_type = #tpu.core_type<tc>, window_params = [{transform_indices = @transform_0, window_bounds = array<i64: 2, 4, 256>}, {transform_indices = @transform_1, window_bounds = array<i64: 2, 256>}]} {
    %c0_i32 = arith.constant 0 : i32
    %0 = arith.cmpi eq, %arg2, %c0_i32 : i32
    %1 = arith.extui %0 : i1 to i32
    %c0_i32_0 = arith.constant 0 : i32
    %2 = arith.cmpi ne, %1, %c0_i32_0 : i32
    scf.if %2 {
      %cst_9 = arith.constant 0.000000e+00 : f32
      %11 = vector.broadcast %cst_9 : f32 to vector<2x256xf32>
      %c0_10 = arith.constant 0 : index
      %c0_11 = arith.constant 0 : index
      %12 = vector.load %arg5[%c0_10, %c0_11] : memref<2x256xf32, #tpu.memory_space<vmem>>, vector<2x256xf32>
      tpu.vector_store %arg5[%c0_10, %c0_11], %11 {strides = array<i32>} : memref<2x256xf32, #tpu.memory_space<vmem>>, vector<2x256xf32>,
    } else {
    }
    %c0 = arith.constant 0 : index
    %c0_1 = arith.constant 0 : index
    %c0_2 = arith.constant 0 : index
    %3 = vector.load %arg3[%c0, %c0_1, %c0_2] : memref<2x4x256xf32, #tpu.memory_space<vmem>>, vector<2x4x256xf32>
    %c0_3 = arith.constant 0 : index
    %c0_4 = arith.constant 0 : index
    %4 = vector.load %arg5[%c0_3, %c0_4] : memref<2x256xf32, #tpu.memory_space<vmem>>, vector<2x256xf32>
    %cst = arith.constant dense<0.000000e+00> : vector<2x256xf32>
    %5 = vector.multi_reduction <add>, %3, %cst [1] : vector<2x4x256xf32> to vector<2x256xf32>
    %6 = arith.addf %4, %5 : vector<2x256xf32>
    %c0_5 = arith.constant 0 : index
    %c0_6 = arith.constant 0 : index
    %7 = vector.load %arg5[%c0_5, %c0_6] : memref<2x256xf32, #tpu.memory_space<vmem>>, vector<2x256xf32>
    tpu.vector_store %arg5[%c0_5, %c0_6], %6 {strides = array<i32>} : memref<2x256xf32, #tpu.memory_space<vmem>>, vector<2x256xf32>,
    %c0_i32_7 = arith.constant 0 : i32
    %8 = arith.cmpi eq, %arg2, %c0_i32_7 : i32
    %9 = arith.extui %8 : i1 to i32
    %c0_i32_8 = arith.constant 0 : i32
    %10 = arith.cmpi ne, %9, %c0_i32_8 : i32
    scf.if %10 {
      %c0_9 = arith.constant 0 : index
      %c0_10 = arith.constant 0 : index
      %11 = vector.load %arg5[%c0_9, %c0_10] : memref<2x256xf32, #tpu.memory_space<vmem>>, vector<2x256xf32>
      %cst_11 = arith.constant 2.500000e-01 : f32
      %12 = vector.broadcast %cst_11 : f32 to vector<2x256xf32>
      %13 = arith.mulf %11, %12 : vector<2x256xf32>
      %c0_12 = arith.constant 0 : index
      %c0_13 = arith.constant 0 : index
      %14 = vector.load %arg4[%c0_12, %c0_13] : memref<2x256xf32, #tpu.memory_space<vmem>>, vector<2x256xf32>
      tpu.vector_store %arg4[%c0_12, %c0_13], %13 {strides = array<i32>} : memref<2x256xf32, #tpu.memory_space<vmem>>, vector<2x256xf32>,
    } else {
    }
    return
  }
  func.func @transform_0(%arg0: i32, %arg1: i32, %arg2: i32) -> (i32, i32, i32) {
    %c0_i32 = arith.constant 0 : i32
    return %arg0, %arg2, %arg1 : i32, i32, i32
  }
  func.func @transform_1(%arg0: i32, %arg1: i32, %arg2: i32) -> (i32, i32) {
    %c0_i32 = arith.constant 0 : i32
    return %arg0, %arg1 : i32, i32
  }
}

</mosaic_0001>

<bundles_post_ra>
// kernel: tpu_custom_call.1
= control target key start
LH: loop header
LB: loop body
LE: loop exit
PB: predicated region body
PF: predicated region fallthrough
CT: control target
= control target key end

     0   :  { %6 = vsyncpa [#allocation4], 0  ;;  %s197_s0 = inlined_call_operand.hbm [shape: f32[2,4,256], index: 0, kind: input, shape index: {}]   ;;  %s198_s1 = inlined_call_operand.hbm [shape: f32[2,256], index: 1, kind: output, shape index: {}]  }
   0x1   :  { %7 = vsyncpa [#allocation5], 0  ;;  %s175_s6 = smov [#allocation3]  }
   0x2   :  { %s13_s7 = sshll.u32 %s175_s6, 4  ;;  %s14_s7 = int_to_ptr.vmem [resolvable:$true] %s13_s7 }
   0x3   :  { %s139_s8 = scalar_lea.vmem %s14_s7, 256  ;;  %p144_p1 = scmp.lt.s32.totalorder %s14_s7, %s14_s7 }
   0x4   :  { %p140_p0 = scmp.ne.s32.totalorder %s14_s7, %s139_s8  ;;  %p145_p2 = scmp.lt.s32.totalorder %s139_s8, %s139_s8 }
   0x6   :  { %p146_p3 = por %p145_p2, %p144_p1 }
   0x8   :  { %p147_p4 = pnand %p146_p3, %p140_p0 }
   0xa   :  { %150 = shalt.err (!%p147_p4)
}
   0xb   :  { %s176_s9 = smov 128   ;;  %s177_s10 = smov 8  }
   0xc   :  { %19 = dma.hbm_to_vmem [thread:$0]  %s197_s0, 256, %s14_s7, [#allocation4], %s176_s9, %s176_s9, %s177_s10  }
   0xd   :  { %171 = dma.done.wait [#allocation4], 256  }
   0xe   :  { %172 = vsyncadd [#allocation4], 4294967040  ;;  %v178_v0 = vmov 0.0   ;;  %vm37_vm0 = vcmask 1043456   ;;  %v28_v1 = vld [vmem:[#allocation3] sm:$0xff]  ;;  %v29_v2 = vld [vmem:[#allocation3 + $0x8] sm:$0xff]  ;;  %v74_v17 = vlaneseq }
   0xf   :  { %27 = vst [vmem:[#allocation2] sm:$0xf] %v178_v0  ;;  %v33_v3 = vcombine.high %v28_v1, %v28_v1  ;;  %v34_v4 = vcombine.high %v29_v2, %v29_v2  ;;  %v38_v5 = vsel %vm37_vm0, %v28_v1, 0.0  ;;  %v52_v6 = vsel %vm37_vm0, %v29_v2, 0.0  ;;  %s180_s0 = smov [#allocation6]  }
  0x10   :  { %v39_v7 = vrot.slane %v38_v5, 4  ;;  %v53_v8 = vrot.slane %v52_v6, 4  ;;  %v179_v15 = vmov 1983009808   ;;  %v75_v27 = vshrl.u32 %v74_v17, 7  ;;  %s114_s13 = sshll.u32 %s180_s0, 4  ;;  %s115_s13 = int_to_ptr.vmem [resolvable:$true] %s114_s13 }
  0x11   :  { %v45_v9 = vsel %vm37_vm0, %v33_v3, 0.0  ;;  %v59_v10 = vsel %vm37_vm0, %v34_v4, 0.0  ;;  %v72_v16 = vunpack.c.l.s4 %v179_v15  ;;  %vm91_vm1 = vcmask 1041409   ;;  %s151_s14 = scalar_lea.vmem %s115_s13, 64  ;;  %p156_p6 = scmp.lt.s32.totalorder %s115_s13, %s115_s13 }
  0x12   :  { %v40_v11 = vadd.f32 %v39_v7, %v38_v5  ;;  %v46_v12 = vrot.slane %v45_v9, 4  ;;  %v54_v13 = vadd.f32 %v53_v8, %v52_v6  ;;  %v60_v14 = vrot.slane %v59_v10, 4  ;;  %p152_p5 = scmp.ne.s32.totalorder %s115_s13, %s151_s14  ;;  %p157_p7 = scmp.lt.s32.totalorder %s151_s14, %s151_s14 }
  0x13   :  { %v73_v26 = vunpack.c.0.s8 %v72_v16  ;;  %vm93_vm2 = vcmask 1043459   ;;  %vm95_vm3 = vcmask 1045509   ;;  %vm97_vm4 = vcmask 1047559  }
  0x14   :  { %v41_v18 = vrot.slane %v40_v11, 2  ;;  %v47_v19 = vadd.f32 %v46_v12, %v45_v9  ;;  %v55_v20 = vrot.slane %v54_v13, 2  ;;  %v61_v21 = vadd.f32 %v60_v14, %v59_v10  ;;  %p158_p8 = por %p157_p7, %p156_p6 }
  0x15   :  { %v76_v38 = vsub.s32 %v73_v26, %v75_v27 }
  0x16   :  { %v42_v22 = vadd.f32 %v41_v18, %v40_v11  ;;  %v48_v23 = vrot.slane %v47_v19, 2  ;;  %v56_v24 = vadd.f32 %v55_v20, %v54_v13  ;;  %v62_v25 = vrot.slane %v61_v21, 2  ;;  %v30_v45 = vld [vmem:[#allocation2] sm:$0xf]  ;;  %p159_p9 = pnand %p158_p8, %p152_p5 }
  0x18   :  { %v43_v28 = vrot.slane %v42_v22, 1  ;;  %v49_v29 = vadd.f32 %v48_v23, %v47_v19  ;;  %v57_v30 = vrot.slane %v56_v24, 1  ;;  %v63_v31 = vadd.f32 %v62_v25, %v61_v21 }
  0x1a   :  { %v44_v32 = vadd.f32 %v43_v28, %v42_v22  ;;  %v50_v33 = vrot.slane %v49_v29, 1  ;;  %v58_v34 = vadd.f32 %v57_v30, %v56_v24  ;;  %v64_v35 = vrot.slane %v63_v31, 1 }
  0x1c   :  { %v51_v36 = vadd.f32 %v50_v33, %v49_v29  ;;  %v65_v37 = vadd.f32 %v64_v35, %v63_v31 }
  0x1e   :  { %v70_v39 = vcombine.low %v44_v32, %v51_v36  ;;  %v78_v40 = vcombine.low %v58_v34, %v65_v37 }
  0x20   :  { %v77_v41 = vrot.slane %v70_v39, %v76_v38  ;;  %v85_v42 = vrot.slane %v78_v40, %v76_v38 }
  0x22   :  { %v90_v43 = vrot.slane %v85_v42, 7 }
  0x24   :  { %v92_v44 = vsel %vm91_vm1, %v90_v43, %v77_v41 }
  0x25   :  { %v94_v46 = vsel %vm93_vm2, %v90_v43, %v92_v44 }
  0x26   :  { %v96_v47 = vsel %vm95_vm3, %v90_v43, %v94_v46 }
  0x27   :  { %v98_v48 = vsel %vm97_vm4, %v90_v43, %v96_v47 }
  0x28   :  { %v100_v49 = vadd.f32 %v98_v48, %v30_v45 }
  0x2a   :  { %101 = vst [vmem:[#allocation2] sm:$0xf] %v100_v49 }
  0x31   :  { %v105_v50 = vld [vmem:[#allocation2] sm:$0xf] }
  0x32   :  { %v106_v51 = vmul.f32 0.25, %v105_v50 }
  0x34   :  { %107 = vst [vmem:[#allocation6] sm:$0xf] %v106_v51 }
  0x35   :  { %162 = shalt.err (!%p159_p9)
}
  0x36   :  { %117 = dma.vmem_to_hbm [thread:$0]  %s115_s13, 64, %s198_s1, [#allocation5]  }
  0x37   :  { %173 = dma.done.wait [#allocation5], 64  }
  0x38   :  { %174 = vsyncadd [#allocation5], 4294967232 }
  0x39   :  { %121 = vsyncpa [#allocation4], 1 }
  0x3a   :  { %122 = vsyncpa [#allocation5], 1 }

</bundles_post_ra>
